<compile_context>
chip_gen: v7x
topology: tpu7x:2x2x1
jax: 0.10.0
libtpu: 0.0.40
codegen_flags: <defaults>
</compile_context>

<pallas_src>
import functools

import jax
import jax.numpy as jnp
from jax import lax
from jax.experimental import pallas as pl
from jax.experimental.pallas import tpu as pltpu

# Candidate-op order of CANDIDATE_OPS_DICT_*:
#  0 ShearX, 1 ShearY, 2 TranslateX, 3 TranslateY, 4 Rotate, 5 Brightness,
#  6 Color, 7 Sharpness, 8 Contrast, 9 Solarize, 10 Posterize, 11 Equalize,
#  12 AutoContrast, 13 Identity
NUM_CANDIDATE_OPS = 14

# In-kernel op ids (pointwise / per-channel-reduction ops only).
(K_IDENTITY, K_BRIGHTNESS, K_COLOR, K_CONTRAST,
 K_SOLARIZE, K_POSTERIZE, K_AUTOCONTRAST) = range(7)

# TODO(synk): geometric ops, Sharpness and Equalize map to Identity.
_CANDIDATE_TO_KERNEL_OP = (
    K_IDENTITY, K_IDENTITY, K_IDENTITY, K_IDENTITY, K_IDENTITY,
    K_BRIGHTNESS, K_COLOR, K_IDENTITY, K_CONTRAST, K_SOLARIZE,
    K_POSTERIZE, K_IDENTITY, K_AUTOCONTRAST, K_IDENTITY)

DEPTH = 2
P_MIN_T, P_MAX_T = 0.2, 0.8
_VMEM_LIMIT_BYTES = 32 * 1024 * 1024      # safe on v5e/v6e/v7x


# ------------------------- per-op branch functions ---------------------------
def _enh(mag):
    # Brightness / Color / Contrast enhancement value range (0.1, 1.9).
    return 0.1 + mag * (1.9 - 0.1)


def _luminance(img):
    # img: (C, R, L) float32 in [0, 255] -> (1, R, L)
    if img.shape[0] == 3:
        return 0.299 * img[0:1] + 0.587 * img[1:2] + 0.114 * img[2:3]
    return jnp.mean(img, axis=0, keepdims=True)


def _op_identity(img, mag):
    return img


def _op_brightness(img, mag):
    return img * _enh(mag)


def _op_color(img, mag):
    gray = _luminance(img)
    return gray + _enh(mag) * (img - gray)


def _op_contrast(img, mag):
    lum = _luminance(img)                                        # (1, R, L)
    mean = jnp.mean(jnp.mean(lum, axis=2, keepdims=True), axis=1, keepdims=True)
    return mean + _enh(mag) * (img - mean)


def _op_solarize(img, mag):
    thr = mag * 256.0
    return jnp.where(img < thr, img, 255.0 - img)


def _op_posterize(img, mag):
    bits_rm = jnp.floor(mag * 4.0)           # bits removed in [0, 4]
    factor = jnp.where(bits_rm < 0.5, 1.0,
             jnp.where(bits_rm < 1.5, 2.0,
             jnp.where(bits_rm < 2.5, 4.0,
             jnp.where(bits_rm < 3.5, 8.0, 16.0))))
    inv_factor = jnp.where(bits_rm < 0.5, 1.0,
                 jnp.where(bits_rm < 1.5, 0.5,
                 jnp.where(bits_rm < 2.5, 0.25,
                 jnp.where(bits_rm < 3.5, 0.125, 0.0625))))
    return jnp.floor(img * inv_factor) * factor


def _op_autocontrast(img, mag):
    cmin = jnp.min(jnp.min(img, axis=2, keepdims=True), axis=1, keepdims=True)
    cmax = jnp.max(jnp.max(img, axis=2, keepdims=True), axis=1, keepdims=True)
    span = cmax - cmin
    ac_scale = 255.0 * pl.reciprocal(jnp.maximum(span, 1e-6), approx=True)
    return jnp.where(span > 0.0, (img - cmin) * ac_scale, img)


_KERNEL_OP_BRANCHES = (_op_identity, _op_brightness, _op_color, _op_contrast,
                       _op_solarize, _op_posterize, _op_autocontrast)


# --------------------------------- kernels -----------------------------------
def _max_kernel(x_ref, o_ref):
    # Tiled global max: (1,1) accumulator resident across the grid.
    @pl.when(pl.program_id(0) == 0)
    def _():
        o_ref[...] = jnp.full((1, 1), -jnp.inf, jnp.float32)

    o_ref[...] = jnp.maximum(o_ref[...], jnp.max(x_ref[...]))


def _ra_kernel(op_ref, mag_ref, scale_ref, x_ref, o_ref, *,
               depth, tile_b, unroll):
    # Block: (TB, C, R, L). One lax.switch per (image, depth) — only the
    # selected op's arithmetic/reductions run.
    blk = pl.program_id(0)
    scale = scale_ref[0]                     # conditional *255, precomputed

    def body(i, carry):
        n = blk * tile_b + i
        img = x_ref[i] * scale               # (C, R, L) float32
        for d in range(depth):               # static unroll over depth
            kop = op_ref[d, n]
            mag = mag_ref[d, n]
            img = lax.switch(kop, _KERNEL_OP_BRANCHES, img, mag)
        o_ref[i] = jnp.clip(img * (1.0 / 255.0), 0.0, 1.0).astype(o_ref.dtype)
        return carry

    lax.fori_loop(0, tile_b, body, 0, unroll=unroll)


# --------------------------------- wrapper ------------------------------------
def _pick_tile_batch(n, img_bytes, vmem_block_budget=16 * 1024 * 1024,
                     max_tb=256):
    # input + output blocks, each double-buffered: 4 * TB * img_bytes <= budget.
    tb = max(1, int(vmem_block_budget // (4 * img_bytes)))
    return int(min(tb, n, max_tb))


def rand_augment_forward(x, ra_deform, rng_key, *, depth=DEPTH,
                         p_min_t=P_MIN_T, p_max_t=P_MAX_T,
                         out_dtype=jnp.float32, assume_max_le_one=None):
    assert x.ndim == 4
    N, C, H, W = x.shape
    assert ra_deform.shape[-1] == N
    x = x.astype(jnp.float32)

    if ra_deform.ndim == 1:
        ra_deform = jnp.stack([ra_deform] * depth, axis=0)       # (depth, N)
    mags = ra_deform.astype(jnp.float32)

    # Lane-dense per-image layout: (C, HW) -> (C, R, 128) when possible.
    HW = H * W
    lanes = 128 if HW % 128 == 0 else HW
    rows = HW // lanes
    xr = x.reshape(N, C, rows, lanes)

    img_bytes = C * HW * 4
    tb = _pick_tile_batch(N, img_bytes)
    n_pad = pl.cdiv(N, tb) * tb

    # Host-side randomness (mirrors torch.randint / np.random.uniform); fold
    # the candidate->kernel-op remap and the apply draw into one op index.
    k_op, k_p, k_draw = jax.random.split(rng_key, 3)
    op_idx = jax.random.randint(k_op, (depth, N), 0, NUM_CANDIDATE_OPS,
                                dtype=jnp.int32)
    prob = jax.random.uniform(k_p, (depth, N), minval=p_min_t, maxval=p_max_t)
    draw = jax.random.uniform(k_draw, (depth, N))
    kop = jnp.asarray(_CANDIDATE_TO_KERNEL_OP, dtype=jnp.int32)[op_idx]
    kop = jnp.where(draw < prob, kop, K_IDENTITY).astype(jnp.int32)

    if n_pad != N:
        pad = n_pad - N
        xr = jnp.pad(xr, ((0, pad), (0, 0), (0, 0), (0, 0)))
        kop = jnp.pad(kop, ((0, 0), (0, pad)))        # padded rows -> Identity
        mags = jnp.pad(mags, ((0, 0), (0, pad)))

    grid = (n_pad // tb,)
    blk_shape = (tb, C, rows, lanes)

    # Pass 1: tiled global max -> conditional *255 scale (torch.max(x) <= 1).
    if assume_max_le_one is None:
        maxval = pl.pallas_call(
            _max_kernel,
            out_shape=jax.ShapeDtypeStruct((1, 1), jnp.float32),
            grid=grid,
            in_specs=[pl.BlockSpec(blk_shape, lambda b: (b, 0, 0, 0))],
            out_specs=pl.BlockSpec((1, 1), lambda b: (0, 0)),
            compiler_params=pltpu.CompilerParams(
                dimension_semantics=("arbitrary",),
                vmem_limit_bytes=_VMEM_LIMIT_BYTES),
        )(xr)
        scale = jnp.where(maxval[0, 0] <= 1.0, 255.0, 1.0)
        scale = scale.reshape(1).astype(jnp.float32)
    else:
        scale = jnp.full((1,), 255.0 if assume_max_le_one else 1.0, jnp.float32)

    # Pass 2: the augmentation kernel itself.
    kernel = functools.partial(_ra_kernel, depth=depth, tile_b=tb,
                               unroll=bool(tb <= 8))
    grid_spec = pltpu.PrefetchScalarGridSpec(
        num_scalar_prefetch=3,                        # kop, mags, scale -> SMEM
        grid=grid,
        in_specs=[pl.BlockSpec(blk_shape, lambda b, *prefetch: (b, 0, 0, 0))],
        out_specs=pl.BlockSpec(blk_shape, lambda b, *prefetch: (b, 0, 0, 0)),
    )
    out = pl.pallas_call(
        kernel,
        out_shape=jax.ShapeDtypeStruct((n_pad, C, rows, lanes), out_dtype),
        grid_spec=grid_spec,
        compiler_params=pltpu.CompilerParams(
            dimension_semantics=("parallel",),
            vmem_limit_bytes=_VMEM_LIMIT_BYTES),
    )(kop, mags, scale, xr)

    return out.reshape(n_pad, C, H, W)[:N]


# ----------------------------------- demo --------------------------------------
if __name__ == "__main__":
    key = jax.random.PRNGKey(0)
    kx, kd, kr = jax.random.split(key, 3)

    # Small RGB batch in [0, 1] (exercises the *255 path), per-sample magnitudes.
    x = jax.random.uniform(kx, (2, 3, 16, 16), dtype=jnp.float32)
    ra_deform = jax.random.uniform(kd, (2,), dtype=jnp.float32)   # (N,) in [0, 1]

    out = rand_augment_forward(x, ra_deform, kr)
    out = jax.block_until_ready(out)

    assert out.shape == x.shape and out.dtype == jnp.float32
    assert bool(jnp.all(out >= 0.0)) and bool(jnp.all(out <= 1.0))
    print("KERNEL_OK")
</pallas_src>

<mosaic_0001>
module attributes {stable_mosaic.version = 11 : i64} {
  func.func @_max_kernel(%arg0: i32, %arg1: memref<2x3x2x128xf32, #tpu.memory_space<vmem>>, %arg2: memref<1x1xf32, #tpu.memory_space<vmem>>) attributes {dimension_semantics = [#tpu.dimension_semantics<arbitrary>], iteration_bounds = array<i64: 1>, scalar_prefetch = 0 : i64, scratch_operands = 0 : i64, tpu.core_type = #tpu.core_type<tc>, window_params = [{transform_indices = @transform_0, window_bounds = array<i64: 2, 3, 2, 128>}, {pipeline_mode = #tpu.pipeline_mode<synchronous>, transform_indices = @transform_1, window_bounds = array<i64: 1, 1>}]} {
    %c0_i32 = arith.constant 0 : i32
    %0 = arith.cmpi eq, %arg0, %c0_i32 : i32
    %1 = arith.extui %0 : i1 to i32
    %c0_i32_0 = arith.constant 0 : i32
    %2 = arith.cmpi ne, %1, %c0_i32_0 : i32
    scf.if %2 {
      %cst_8 = arith.constant 0xFF800000 : f32
      %12 = vector.broadcast %cst_8 : f32 to vector<1x1xf32>
      %c0_9 = arith.constant 0 : index
      %c0_10 = arith.constant 0 : index
      %13 = vector.load %arg2[%c0_9, %c0_10] : memref<1x1xf32, #tpu.memory_space<vmem>>, vector<1x1xf32>
      tpu.vector_store %arg2[%c0_9, %c0_10], %12 {strides = array<i32>} : memref<1x1xf32, #tpu.memory_space<vmem>>, vector<1x1xf32>,
    } else {
    }
    %c0 = arith.constant 0 : index
    %c0_1 = arith.constant 0 : index
    %3 = vector.load %arg2[%c0, %c0_1] : memref<1x1xf32, #tpu.memory_space<vmem>>, vector<1x1xf32>
    %c0_2 = arith.constant 0 : index
    %c0_3 = arith.constant 0 : index
    %c0_4 = arith.constant 0 : index
    %c0_5 = arith.constant 0 : index
    %4 = vector.load %arg1[%c0_2, %c0_3, %c0_4, %c0_5] : memref<2x3x2x128xf32, #tpu.memory_space<vmem>>, vector<2x3x2x128xf32>
    %5 = vector.shape_cast %4 : vector<2x3x2x128xf32> to vector<1x2x3x2x128xf32>
    %cst = arith.constant dense<0xFF800000> : vector<1xf32>
    %6 = vector.multi_reduction <maximumf>, %5, %cst [1, 2, 3, 4] : vector<1x2x3x2x128xf32> to vector<1xf32>
    %7 = vector.shape_cast %6 : vector<1xf32> to vector<1x1x1x1x1xf32>
    %8 = vector.extract %7[0, 0, 0, 0, 0] : f32 from vector<1x1x1x1x1xf32>
    %9 = vector.broadcast %8 : f32 to vector<1x1xf32>
    %10 = arith.maximumf %3, %9 : vector<1x1xf32>
    %c0_6 = arith.constant 0 : index
    %c0_7 = arith.constant 0 : index
    %11 = vector.load %arg2[%c0_6, %c0_7] : memref<1x1xf32, #tpu.memory_space<vmem>>, vector<1x1xf32>
    tpu.vector_store %arg2[%c0_6, %c0_7], %10 {strides = array<i32>} : memref<1x1xf32, #tpu.memory_space<vmem>>, vector<1x1xf32>,
    return
  }
  func.func @transform_0(%arg0: i32) -> (i32, i32, i32, i32) {
    %c0_i32 = arith.constant 0 : i32
    %c0_i32_0 = arith.constant 0 : i32
    %c0_i32_1 = arith.constant 0 : i32
    %c0_i32_2 = arith.constant 0 : i32
    return %arg0, %c0_i32, %c0_i32_0, %c0_i32_1 : i32, i32, i32, i32
  }
  func.func @transform_1(%arg0: i32) -> (i32, i32) {
    %c0_i32 = arith.constant 0 : i32
    %c0_i32_0 = arith.constant 0 : i32
    %c0_i32_1 = arith.constant 0 : i32
    return %c0_i32, %c0_i32_0 : i32, i32
  }
}

</mosaic_0001>

<bundles_post_ra>
// kernel: tpu_custom_call.1
= control target key start
LH: loop header
LB: loop body
LE: loop exit
PB: predicated region body
PF: predicated region fallthrough
CT: control target
= control target key end

     0   :  { %6 = vsyncpa [#allocation3], 0  ;;  %s172_s0 = inlined_call_operand.hbm [shape: f32[2,3,2,128], index: 0, kind: input, shape index: {}]   ;;  %s173_s1 = inlined_call_operand.hbm [shape: f32[1,1], index: 1, kind: output, shape index: {}]  }
   0x1   :  { %7 = vsyncpa [#allocation4], 0  ;;  %s131_s6 = smov [#allocation2]   ;;  %s83_s10 = scalar_lea.hbm %s172_s0, 192 }
   0x2   :  { %s13_s7 = sshll.u32 %s131_s6, 4  ;;  %p84_p0 = scmp.ne.s32.totalorder %s172_s0, %s83_s10  ;;  %s14_s7 = int_to_ptr.vmem [resolvable:$true] %s13_s7 }
   0x3   :  { %p87_p1 = scmp.lt.u32.totalorder %s83_s10, %s172_s0 }
   0x5   :  { %p89_p2 = pnand %p87_p1, %p84_p0 }
   0x7   :  { %92 = shalt.err (!%p89_p2)
}
   0x8   :  { %s93_s15 = scalar_lea.vmem %s14_s7, 192  ;;  %p98_p4 = scmp.lt.s32.totalorder %s14_s7, %s14_s7 }
   0x9   :  { %p94_p3 = scmp.ne.s32.totalorder %s14_s7, %s93_s15  ;;  %p99_p5 = scmp.lt.s32.totalorder %s93_s15, %s93_s15 }
   0xb   :  { %p100_p6 = por %p99_p5, %p98_p4 }
   0xd   :  { %p101_p7 = pnand %p100_p6, %p94_p3 }
   0xf   :  { %104 = shalt.err (!%p101_p7)
}
  0x10   :  { %s132_s16 = smov 32   ;;  %s133_s17 = smov 2  }
  0x11   :  { %19 = dma.hbm_to_vmem [thread:$0]  %s172_s0, 192, %s14_s7, [#allocation3], %s132_s16, %s132_s16, %s133_s17  }
  0x12   :  { %127 = dma.done.wait [#allocation3], 192  }
  0x13   :  { %128 = vsyncadd [#allocation3], 4294967104  ;;  %vm27_vm0 = vcmask 0   ;;  %v134_v0 = vmov -inf   ;;  %vm36_vm1 = vcmask 1041408   ;;  %s135_s0 = smov [#allocation5]  }
  0x14   :  { %28 = vst.msk [vmem:[#allocation5] sm:$0x1] %vm27_vm0, %v134_v0  ;;  %v30_v1 = vld [vmem:[#allocation2] sm:$0x3]  ;;  %v31_v2 = vld [vmem:[#allocation2 + $0x2] sm:$0x3] }
  0x15   :  { %v32_v3 = vld [vmem:[#allocation2 + $0x4] sm:$0x3]  ;;  %v33_v4 = vld [vmem:[#allocation2 + $0x6] sm:$0x3]  ;;  %v34_v5 = vld [vmem:[#allocation2 + $0x8] sm:$0x3] }
  0x16   :  { %v35_v6 = vld [vmem:[#allocation2 + $0xa] sm:$0x3]  ;;  %v37_v7 = vsel %vm36_vm1, %v30_v1, -inf  ;;  %v38_v8 = vsel %vm36_vm1, %v31_v2, -inf  ;;  %v39_v9 = vsel %vm36_vm1, %v32_v3, -inf  ;;  %v40_v10 = vsel %vm36_vm1, %v33_v4, -inf }
  0x17   :  { %v41_v11 = vsel %vm36_vm1, %v34_v5, -inf  ;;  %v43_v12 = vsel %vm36_vm1, %v35_v6, -inf  ;;  %v46_v15 = vmax.f32 %v39_v9, %v40_v10  ;;  %s67_s20 = sshll.u32 %s135_s0, 4  ;;  %s68_s20 = int_to_ptr.vmem [resolvable:$true] %s67_s20 }
  0x18   :  { %v42_v13 = vmax.f32 %v37_v7, %v41_v11  ;;  %v44_v14 = vmax.f32 %v38_v8, %v43_v12  ;;  %s105_s22 = scalar_lea.vmem %s68_s20, 16  ;;  %s109_s23 = scalar_lea.vmem %s68_s20, 32 }
  0x19   :  { %p106_p8 = scmp.ne.s32.totalorder %s68_s20, %s105_s22  ;;  %p110_p9 = scmp.lt.s32.totalorder %s68_s20, %s68_s20 }
  0x1a   :  { %v45_v16 = vmax.f32 %v42_v13, %v44_v14  ;;  %p111_p10 = scmp.lt.s32.totalorder %s109_s23, %s105_s22 }
  0x1b   :  { %v29_v25 = vld [vmem:[#allocation5] sm:$0x1] }
  0x1c   :  { %v47_v17 = vmax.f32 %v45_v16, %v46_v15  ;;  %p112_p11 = por %p111_p10, %p110_p9 }
  0x1e   :  { %48 = vmax.xlane.f32.xlu0 %v47_v17  ;;  %p113_p12 = pnand %p112_p11, %p106_p8 }
  0xab   :  { %v49_v18 = vpop.xlane.xlu0 %48 }
  0xac   :  { %v50_v19 = vrot.slane %v49_v18, 4 }
  0xae   :  { %v51_v20 = vmax.f32 %v49_v18, %v50_v19 }
  0xb0   :  { %v52_v21 = vrot.slane %v51_v20, 2 }
  0xb2   :  { %v53_v22 = vmax.f32 %v51_v20, %v52_v21 }
  0xb4   :  { %v54_v23 = vrot.slane %v53_v22, 1 }
  0xb6   :  { %v55_v24 = vmax.f32 %v53_v22, %v54_v23 }
  0xb8   :  { %76 = vpush %v55_v24 }
  0xe9   :  { %s77_s21 = spop %76 }
  0xea   :  { %v57_v26 = vstv %s77_s21 }
  0xeb   :  { %v58_v27 = vmax.f32 %v29_v25, %v57_v26 }
  0xed   :  { %60 = vst.msk [vmem:[#allocation5] sm:$0x1] %vm27_vm0, %v58_v27 }
  0xee   :  { %116 = shalt.err (!%p113_p12)
}
  0xef   :  { %s117_s26 = scalar_lea.hbm %s173_s1, 16 }
  0xf0   :  { %p118_p13 = scmp.ne.s32.totalorder %s173_s1, %s117_s26  ;;  %p121_p0 = scmp.lt.u32.totalorder %s117_s26, %s173_s1 }
  0xf2   :  { %p123_p1 = pnand %p121_p0, %p118_p13 }
  0xf4   :  { %126 = shalt.err (!%p123_p1)
}
  0xf5   :  { %70 = dma.vmem_to_hbm [thread:$0]  %s68_s20, 16, %s173_s1, [#allocation4]  }
  0xf6   :  { %129 = dma.done.wait [#allocation4], 16  }
  0xf7   :  { %130 = vsyncadd [#allocation4], 4294967280 }
  0xf8   :  { %74 = vsyncpa [#allocation3], 1 }
  0xf9   :  { %75 = vsyncpa [#allocation4], 1 }

</bundles_post_ra>
